<compile_context>
chip_gen: v5e
topology: v5e:2x2
jax: 0.10.0
libtpu: 0.0.40
codegen_flags: <defaults>
</compile_context>

<pallas_src>
import functools

import jax
import jax.numpy as jnp
from jax.experimental import pallas as pl
from jax.experimental.pallas import tpu as pltpu

KERNEL_SIZE = 25  # series_decomp moving-average window


def _round_up(x, m):
    return ((x + m - 1) // m) * m


def _choose_row_tile(n):
    """Row (sublane) tile: multiple of 16 for bf16 packing, >=4 grid steps for
    moderately large N (megacore sharding + DMA/compute overlap), capped at 512."""
    if n < 64:
        return _round_up(max(n, 1), 16)
    target_steps = 4 if n >= 256 else 2
    return int(min(512, _round_up(-(-n // target_steps), 16)))


# ----------------------------------------------------------------------------
# Pallas kernel: fused (pad + decomp + branch MLPs) matmul, gate, output layer.
# ----------------------------------------------------------------------------
def gated_sum_kernel(x_ref, weff_ref, beff_ref, wo_ref, bo_ref,
                     wog_ref, bog_ref, out_ref, *, h_pad):
    # One fused bf16 MXU matmul = edge padding + series_decomp + both branch Linears.
    h = jnp.dot(x_ref[...], weff_ref[...],
                preferred_element_type=jnp.float32) + beff_ref[...]
    h = jnp.maximum(h, 0.0)                                  # (TN, 2*h_pad), f32

    # h_pad is a multiple of 128 -> both slices are lane-aligned free views.
    th = h[:, :h_pad]                                        # trend-branch hidden
    rh = h[:, h_pad:]                                        # residual-branch hidden

    # Output gate folded ahead of the shared output layer (wog = wo@wg, bog = bo@wg+bg):
    # VPU multiply + XLU lane reduce, no serial dependence on the output matmul.
    gate = jax.nn.sigmoid(
        jnp.sum(th * wog_ref[...], axis=-1, keepdims=True) + bog_ref[0, 0])

    # output_layer is linear, so gate the hidden states first and run a single
    # shared (TN, h_pad) @ (h_pad, P_pad) matmul with a lane-dense output.
    mixed = rh + gate * (th - rh)                            # (TN, h_pad), f32
    out = jnp.dot(mixed, wo_ref[...],
                  preferred_element_type=jnp.float32) + bo_ref[...]
    out_ref[...] = out.astype(out_ref.dtype)


def _pallas_forward(x_rows, w_eff, b_eff, wo_p, bo_p, wog, bog,
                    *, tn, h_pad, p_pad, out_dtype, single_buffer_weights):
    n_pad, seq_len = x_rows.shape
    grid = (n_pad // tn,)
    const_kw = (dict(pipeline_mode=pl.Buffered(1))
                if single_buffer_weights else {})
    return pl.pallas_call(
        functools.partial(gated_sum_kernel, h_pad=h_pad),
        out_shape=jax.ShapeDtypeStruct((n_pad, p_pad), out_dtype),
        grid_spec=pltpu.PrefetchScalarGridSpec(
            num_scalar_prefetch=0,
            grid=grid,
            in_specs=[
                pl.BlockSpec((tn, seq_len), lambda i: (i, 0)),                    # streamed rows (bf16)
                pl.BlockSpec((seq_len, 2 * h_pad), lambda i: (0, 0), **const_kw),  # fused branch W (bf16)
                pl.BlockSpec((1, 2 * h_pad), lambda i: (0, 0), **const_kw),        # fused branch b
                pl.BlockSpec((h_pad, p_pad), lambda i: (0, 0), **const_kw),        # output_layer W (padded)
                pl.BlockSpec((1, p_pad), lambda i: (0, 0), **const_kw),            # output_layer b (padded)
                pl.BlockSpec((1, h_pad), lambda i: (0, 0), **const_kw),            # folded gate W
                pl.BlockSpec(memory_space=pltpu.MemorySpace.SMEM),                 # folded gate b (scalar)
            ],
            out_specs=pl.BlockSpec((tn, p_pad), lambda i: (i, 0)),
        ),
        compiler_params=pltpu.CompilerParams(
            dimension_semantics=("parallel",)),
    )(x_rows, w_eff, b_eff, wo_p, bo_p, wog, bog)


# ----------------------------------------------------------------------------
# Wrapper: weight folding / padding / layout plumbing in JAX, hot path in Pallas.
# ----------------------------------------------------------------------------
def gated_sum_forward(x, params, *, pred_len, hidden_units, permute_output=True):
    B, L, C = x.shape
    K = KERNEL_SIZE
    pad = (K - 1) // 2
    Lp = L + K - 1
    f32 = jnp.float32

    wt, bt, wr, br, wo, bo, wg, bg = params

    H = hidden_units
    H_pad = _round_up(H, 128)            # th/rh split lands on a 128-lane boundary
    P_pad = _round_up(pred_len, 128)     # lane-dense output stores

    # ---- fold edge replication + series_decomp into the branch weights --------
    #   xpad[:, i] = x[:, clamp(i - pad, 0, L-1)]   (edge replication E, (L, Lp))
    #   trend      = xpad @ A          => trend    = x @ (E @ A)
    #   residual   = x - trend         => residual = x @ (I - E @ A)
    # The kernel never sees the padded sequence: per-row DMA is L, not L + K - 1.
    src = jnp.clip(jnp.arange(Lp) - pad, 0, L - 1)
    E = (jnp.arange(L)[:, None] == src[None, :]).astype(f32)        # (L, Lp)
    ii = jnp.arange(Lp)[:, None]
    ll = jnp.arange(L)[None, :]
    A = ((ii >= ll) & (ii < ll + K)).astype(f32) / K                # (Lp, L)
    M = E @ A                                                       # (L, L) moving average
    w_trend = jnp.pad(M @ wt, ((0, 0), (0, H_pad - H)))             # zero cols -> inert
    w_resid = jnp.pad((jnp.eye(L, dtype=f32) - M) @ wr, ((0, 0), (0, H_pad - H)))
    w_eff = jnp.concatenate([w_trend, w_resid], axis=1)             # (L, 2*H_pad)
    b_eff = jnp.concatenate([jnp.pad(bt, ((0, 0), (0, H_pad - H))),
                             jnp.pad(br, ((0, 0), (0, H_pad - H)))], axis=1)

    # ---- fold output_layer into the gate (one-time precompute) ----------------
    wog = jnp.pad((wo @ wg).reshape(1, H), ((0, 0), (0, H_pad - H)))  # (1, H_pad)
    bog = (bo @ wg + bg).reshape(1, 1)                                # scalar, goes to SMEM

    # ---- hidden-padded, lane-dense output layer (zero rows/cols are inert) ----
    wo_p = jnp.pad(wo, ((0, H_pad - H), (0, P_pad - pred_len)))       # (H_pad, P_pad)
    bo_p = jnp.pad(bo, ((0, 0), (0, P_pad - pred_len)))               # (1, P_pad)

    # ---- rows = (batch, channel); stream as bf16 to halve input HBM traffic ----
    x_rows = jnp.transpose(x, (0, 2, 1)).reshape(B * C, L).astype(jnp.bfloat16)
    N = B * C
    TN = _choose_row_tile(N)
    N_pad = _round_up(N, TN)
    if N_pad != N:
        x_rows = jnp.pad(x_rows, ((0, N_pad - N), (0, 0)))            # zero rows, sliced off later

    args = (x_rows, w_eff.astype(jnp.bfloat16), b_eff, wo_p, bo_p, wog, bog)
    kw = dict(tn=TN, h_pad=H_pad, p_pad=P_pad, out_dtype=x.dtype)
    try:
        out_flat = _pallas_forward(*args, **kw, single_buffer_weights=True)
    except Exception:
        # JAX/Mosaic versions without per-BlockSpec pipeline_mode support: fall back
        # to default double buffering of the (small, never-changing) weight blocks.
        out_flat = _pallas_forward(*args, **kw, single_buffer_weights=False)

    out = out_flat[:N, :pred_len].reshape(B, C, pred_len)
    if permute_output:
        # Matches the module's `.permute(0, 2, 1)`; consumers that accept
        # (B, C, pred_len) can pass permute_output=False and skip this HBM pass.
        out = jnp.transpose(out, (0, 2, 1))                           # (B, pred_len, C)
    return out


# ----------------------------------------------------------------------------
# Pure-JAX reference (mirrors the assumed PyTorch semantics exactly, unfused, f32).
# ----------------------------------------------------------------------------
def gated_sum_reference(x, params):
    wt, bt, wr, br, wo, bo, wg, bg = params
    B, L, C = x.shape
    pad = (KERNEL_SIZE - 1) // 2
    front = jnp.repeat(x[:, :1, :], pad, axis=1)
    end = jnp.repeat(x[:, -1:, :], pad, axis=1)
    xp = jnp.concatenate([front, x, end], axis=1)                  # (B, Lp, C)
    trend = sum(xp[:, k:k + L, :] for k in range(KERNEL_SIZE)) / KERNEL_SIZE
    resid = x - trend
    trend = jnp.transpose(trend, (0, 2, 1))                        # (B, C, L)
    resid = jnp.transpose(resid, (0, 2, 1))
    th = jax.nn.relu(trend @ wt + bt)                              # (B, C, H)
    rh = jax.nn.relu(resid @ wr + br)
    ot = th @ wo + bo                                              # (B, C, P)
    orr = rh @ wo + bo
    g = jax.nn.sigmoid(ot @ wg + bg)                               # (B, C, 1)
    ws = ot * g + orr * (1.0 - g)
    return jnp.transpose(ws, (0, 2, 1))                            # (B, P, C)


# ----------------------------------------------------------------------------
def init_params(key, seq_len, hidden_units, pred_len):
    def linear(key, fan_in, fan_out):
        k1, k2 = jax.random.split(key)
        bound = 1.0 / (fan_in ** 0.5)
        w = jax.random.uniform(k1, (fan_in, fan_out), jnp.float32, -bound, bound)
        b = jax.random.uniform(k2, (1, fan_out), jnp.float32, -bound, bound)
        return w, b

    k1, k2, k3, k4 = jax.random.split(key, 4)
    wt, bt = linear(k1, seq_len, hidden_units)       # gated_mlp trend branch
    wr, br = linear(k2, seq_len, hidden_units)       # gated_mlp residual branch
    wo, bo = linear(k3, hidden_units, pred_len)      # output_layer
    wg, bg = linear(k4, pred_len, 1)                 # output_gate (Linear -> Sigmoid)
    return (wt, bt, wr, br, wo, bo, wg, bg)


if __name__ == "__main__":
    batch, seq_len, num_features = 2, 48, 4
    pred_len, hidden_units = 24, 32

    key = jax.random.PRNGKey(0)
    kx, kp = jax.random.split(key)
    x = jax.random.normal(kx, (batch, seq_len, num_features), jnp.float32)
    params = init_params(kp, seq_len, hidden_units, pred_len)

    out = gated_sum_forward(x, params, pred_len=pred_len, hidden_units=hidden_units)
    out = jax.block_until_ready(out)

    ref = gated_sum_reference(x, params)
    assert out.shape == (batch, pred_len, num_features), out.shape
    err = float(jnp.max(jnp.abs(out - ref)))
    # Tolerance loosened vs. the f32 reference because the row input / fused branch
    # weights are streamed as bfloat16 (f32 accumulation); observed error << 6e-2.
    assert jnp.allclose(out, ref, atol=6e-2, rtol=6e-2), err
    print("KERNEL_OK")
</pallas_src>

<mosaic_0001>
module attributes {stable_mosaic.version = 11 : i64} {
  func.func @gated_sum_kernel(%arg0: i32, %arg1: memref<16x48xbf16, #tpu.memory_space<vmem>>, %arg2: memref<48x256xbf16, #tpu.memory_space<vmem>>, %arg3: memref<1x256xf32, #tpu.memory_space<vmem>>, %arg4: memref<128x128xf32, #tpu.memory_space<vmem>>, %arg5: memref<1x128xf32, #tpu.memory_space<vmem>>, %arg6: memref<1x128xf32, #tpu.memory_space<vmem>>, %arg7: memref<1x1xf32, #tpu.memory_space<smem>>, %arg8: memref<16x128xf32, #tpu.memory_space<vmem>>) attributes {dimension_semantics = [#tpu.dimension_semantics<parallel>], iteration_bounds = array<i64: 1>, scalar_prefetch = 0 : i64, scratch_operands = 0 : i64, tpu.core_type = #tpu.core_type<tc>, window_params = [{transform_indices = @transform_0, window_bounds = array<i64: 16, 48>}, {pipeline_mode = #tpu.pipeline_mode<synchronous>, transform_indices = @transform_1, window_bounds = array<i64: 48, 256>}, {pipeline_mode = #tpu.pipeline_mode<synchronous>, transform_indices = @transform_2, window_bounds = array<i64: 1, 256>}, {pipeline_mode = #tpu.pipeline_mode<synchronous>, transform_indices = @transform_3, window_bounds = array<i64: 128, 128>}, {pipeline_mode = #tpu.pipeline_mode<synchronous>, transform_indices = @transform_4, window_bounds = array<i64: 1, 128>}, {pipeline_mode = #tpu.pipeline_mode<synchronous>, transform_indices = @transform_5, window_bounds = array<i64: 1, 128>}, {transform_indices = @transform_6, window_bounds = array<i64: 1, 1>}, {transform_indices = @transform_7, window_bounds = array<i64: 16, 128>}]} {
    %c0 = arith.constant 0 : index
    %c0_0 = arith.constant 0 : index
    %0 = vector.load %arg1[%c0, %c0_0] : memref<16x48xbf16, #tpu.memory_space<vmem>>, vector<16x48xbf16>
    %c0_1 = arith.constant 0 : index
    %c0_2 = arith.constant 0 : index
    %1 = vector.load %arg2[%c0_1, %c0_2] : memref<48x256xbf16, #tpu.memory_space<vmem>>, vector<48x256xbf16>
    %cst = arith.constant dense<0.000000e+00> : vector<16x256xf32>
    %2 = tpu.matmul %0, %1, %cst {dimension_numbers = #tpu.dot_dimension_numbers<[1], [0], [0], [1], [0, 0, 1, 1], [], []>} : vector<16x48xbf16>, vector<48x256xbf16>, vector<16x256xf32> -> vector<16x256xf32>
    %c0_3 = arith.constant 0 : index
    %c0_4 = arith.constant 0 : index
    %3 = vector.load %arg3[%c0_3, %c0_4] : memref<1x256xf32, #tpu.memory_space<vmem>>, vector<1x256xf32>
    %4 = vector.broadcast %3 : vector<1x256xf32> to vector<16x256xf32>
    %5 = arith.addf %2, %4 : vector<16x256xf32>
    %cst_5 = arith.constant 0.000000e+00 : f32
    %6 = vector.broadcast %cst_5 : f32 to vector<16x256xf32>
    %7 = arith.maximumf %5, %6 : vector<16x256xf32>
    %8 = vector.extract_strided_slice %7 {offsets = [0, 0], sizes = [16, 128], strides = [1, 1]} : vector<16x256xf32> to vector<16x128xf32>
    %9 = vector.extract_strided_slice %7 {offsets = [0, 128], sizes = [16, 128], strides = [1, 1]} : vector<16x256xf32> to vector<16x128xf32>
    %c0_6 = arith.constant 0 : index
    %c0_7 = arith.constant 0 : index
    %10 = vector.load %arg6[%c0_6, %c0_7] : memref<1x128xf32, #tpu.memory_space<vmem>>, vector<1x128xf32>
    %11 = vector.broadcast %10 : vector<1x128xf32> to vector<16x128xf32>
    %12 = arith.mulf %8, %11 : vector<16x128xf32>
    %cst_8 = arith.constant dense<0.000000e+00> : vector<16xf32>
    %13 = vector.multi_reduction <add>, %12, %cst_8 [1] : vector<16x128xf32> to vector<16xf32>
    %14 = vector.shape_cast %13 : vector<16xf32> to vector<16x1xf32>
    %c0_9 = arith.constant 0 : index
    %c0_10 = arith.constant 0 : index
    %15 = memref.load %arg7[%c0_9, %c0_10] : memref<1x1xf32, #tpu.memory_space<smem>>
    %16 = vector.broadcast %15 : f32 to vector<16x1xf32>
    %17 = arith.addf %14, %16 : vector<16x1xf32>
    %18 = arith.negf %17 : vector<16x1xf32>
    %19 = math.exp %18 : vector<16x1xf32>
    %cst_11 = arith.constant 1.000000e+00 : f32
    %20 = vector.broadcast %cst_11 : f32 to vector<16x1xf32>
    %21 = arith.addf %20, %19 : vector<16x1xf32>
    %22 = arith.divf %20, %21 : vector<16x1xf32>
    %23 = arith.subf %8, %9 : vector<16x128xf32>
    %24 = vector.broadcast %22 : vector<16x1xf32> to vector<16x128xf32>
    %25 = arith.mulf %24, %23 : vector<16x128xf32>
    %26 = arith.addf %9, %25 : vector<16x128xf32>
    %c0_12 = arith.constant 0 : index
    %c0_13 = arith.constant 0 : index
    %27 = vector.load %arg4[%c0_12, %c0_13] : memref<128x128xf32, #tpu.memory_space<vmem>>, vector<128x128xf32>
    %cst_14 = arith.constant dense<0.000000e+00> : vector<16x128xf32>
    %28 = tpu.matmul %26, %27, %cst_14 {dimension_numbers = #tpu.dot_dimension_numbers<[1], [0], [0], [1], [0, 0, 1, 1], [], []>} : vector<16x128xf32>, vector<128x128xf32>, vector<16x128xf32> -> vector<16x128xf32>
    %c0_15 = arith.constant 0 : index
    %c0_16 = arith.constant 0 : index
    %29 = vector.load %arg5[%c0_15, %c0_16] : memref<1x128xf32, #tpu.memory_space<vmem>>, vector<1x128xf32>
    %30 = vector.broadcast %29 : vector<1x128xf32> to vector<16x128xf32>
    %31 = arith.addf %28, %30 : vector<16x128xf32>
    %c0_17 = arith.constant 0 : index
    %c0_18 = arith.constant 0 : index
    %32 = vector.load %arg8[%c0_17, %c0_18] : memref<16x128xf32, #tpu.memory_space<vmem>>, vector<16x128xf32>
    tpu.vector_store %arg8[%c0_17, %c0_18], %31 {strides = array<i32>} : memref<16x128xf32, #tpu.memory_space<vmem>>, vector<16x128xf32>,
    return
  }
  func.func @transform_0(%arg0: i32) -> (i32, i32) {
    %c0_i32 = arith.constant 0 : i32
    %c0_i32_0 = arith.constant 0 : i32
    return %arg0, %c0_i32 : i32, i32
  }
  func.func @transform_1(%arg0: i32) -> (i32, i32) {
    %c0_i32 = arith.constant 0 : i32
    %c0_i32_0 = arith.constant 0 : i32
    %c0_i32_1 = arith.constant 0 : i32
    return %c0_i32, %c0_i32_0 : i32, i32
  }
  func.func @transform_2(%arg0: i32) -> (i32, i32) {
    %c0_i32 = arith.constant 0 : i32
    %c0_i32_0 = arith.constant 0 : i32
    %c0_i32_1 = arith.constant 0 : i32
    return %c0_i32, %c0_i32_0 : i32, i32
  }
  func.func @transform_3(%arg0: i32) -> (i32, i32) {
    %c0_i32 = arith.constant 0 : i32
    %c0_i32_0 = arith.constant 0 : i32
    %c0_i32_1 = arith.constant 0 : i32
    return %c0_i32, %c0_i32_0 : i32, i32
  }
  func.func @transform_4(%arg0: i32) -> (i32, i32) {
    %c0_i32 = arith.constant 0 : i32
    %c0_i32_0 = arith.constant 0 : i32
    %c0_i32_1 = arith.constant 0 : i32
    return %c0_i32, %c0_i32_0 : i32, i32
  }
  func.func @transform_5(%arg0: i32) -> (i32, i32) {
    %c0_i32 = arith.constant 0 : i32
    %c0_i32_0 = arith.constant 0 : i32
    %c0_i32_1 = arith.constant 0 : i32
    return %c0_i32, %c0_i32_0 : i32, i32
  }
  func.func @transform_6(%arg0: i32) -> (i32, i32) {
    %c0_i32 = arith.constant 0 : i32
    %c0_i32_0 = arith.constant 0 : i32
    %c0_i32_1 = arith.constant 0 : i32
    return %c0_i32, %c0_i32_0 : i32, i32
  }
  func.func @transform_7(%arg0: i32) -> (i32, i32) {
    %c0_i32 = arith.constant 0 : i32
    %c0_i32_0 = arith.constant 0 : i32
    return %arg0, %c0_i32 : i32, i32
  }
}

module attributes {stable_mosaic.version = 11 : i64} {
  func.func @gated_sum_kernel(%arg0: i32, %arg1: memref<16x48xbf16, #tpu.memory_space<vmem>>, %arg2: memref<48x256xbf16, #tpu.memory_space<vmem>>, %arg3: memref<1x256xf32, #tpu.memory_space<vmem>>, %arg4: memref<128x128xf32, #tpu.memory_space<vmem>>, %arg5: memref<1x128xf32, #tpu.memory_space<vmem>>, %arg6: memref<1x128xf32, #tpu.memory_space<vmem>>, %arg7: memref<1x1xf32, #tpu.memory_space<smem>>, %arg8: memref<16x128xf32, #tpu.memory_space<vmem>>) attributes {dimension_semantics = [#tpu.dimension_semantics<parallel>], iteration_bounds = array<i64: 1>, scalar_prefetch = 0 : i64, scratch_operands = 0 : i64, tpu.core_type = #tpu.core_type<tc>, window_params = [{transform_indices = @transform_0, window_bounds = array<i64: 16, 48>}, {pipeline_mode = #tpu.pipeline_mode<synchronous>, transform_indices = @transform_1, window_bounds = array<i64: 48, 256>}, {pipeline_mode = #tpu.pipeline_mode<synchronous>, transform_indices = @transform_2, window_bounds = array<i64: 1, 256>}, {pipeline_mode = #tpu.pipeline_mode<synchronous>, transform_indices = @transform_3, window_bounds = array<i64: 128, 128>}, {pipeline_mode = #tpu.pipeline_mode<synchronous>, transform_indices = @transform_4, window_bounds = array<i64: 1, 128>}, {pipeline_mode = #tpu.pipeline_mode<synchronous>, transform_indices = @transform_5, window_bounds = array<i64: 1, 128>}, {transform_indices = @transform_6, window_bounds = array<i64: 1, 1>}, {transform_indices = @transform_7, window_bounds = array<i64: 16, 128>}]} {
    %c0 = arith.constant 0 : index
    %c0_0 = arith.constant 0 : index
    %0 = vector.load %arg1[%c0, %c0_0] : memref<16x48xbf16, #tpu.memory_space<vmem>>, vector<16x48xbf16>
    %c0_1 = arith.constant 0 : index
    %c0_2 = arith.constant 0 : index
    %1 = vector.load %arg2[%c0_1, %c0_2] : memref<48x256xbf16, #tpu.memory_space<vmem>>, vector<48x256xbf16>
    %cst = arith.constant dense<0.000000e+00> : vector<16x256xf32>
    %2 = tpu.matmul %0, %1, %cst {dimension_numbers = #tpu.dot_dimension_numbers<[1], [0], [0], [1], [0, 0, 1, 1], [], []>} : vector<16x48xbf16>, vector<48x256xbf16>, vector<16x256xf32> -> vector<16x256xf32>
    %c0_3 = arith.constant 0 : index
    %c0_4 = arith.constant 0 : index
    %3 = vector.load %arg3[%c0_3, %c0_4] : memref<1x256xf32, #tpu.memory_space<vmem>>, vector<1x256xf32>
    %4 = vector.broadcast %3 : vector<1x256xf32> to vector<16x256xf32>
    %5 = arith.addf %2, %4 : vector<16x256xf32>
    %cst_5 = arith.constant 0.000000e+00 : f32
    %6 = vector.broadcast %cst_5 : f32 to vector<16x256xf32>
    %7 = arith.maximumf %5, %6 : vector<16x256xf32>
    %8 = vector.extract_strided_slice %7 {offsets = [0, 0], sizes = [16, 128], strides = [1, 1]} : vector<16x256xf32> to vector<16x128xf32>
    %9 = vector.extract_strided_slice %7 {offsets = [0, 128], sizes = [16, 128], strides = [1, 1]} : vector<16x256xf32> to vector<16x128xf32>
    %c0_6 = arith.constant 0 : index
    %c0_7 = arith.constant 0 : index
    %10 = vector.load %arg6[%c0_6, %c0_7] : memref<1x128xf32, #tpu.memory_space<vmem>>, vector<1x128xf32>
    %11 = vector.broadcast %10 : vector<1x128xf32> to vector<16x128xf32>
    %12 = arith.mulf %8, %11 : vector<16x128xf32>
    %cst_8 = arith.constant dense<0.000000e+00> : vector<16xf32>
    %13 = vector.multi_reduction <add>, %12, %cst_8 [1] : vector<16x128xf32> to vector<16xf32>
    %14 = vector.shape_cast %13 : vector<16xf32> to vector<16x1xf32>
    %c0_9 = arith.constant 0 : index
    %c0_10 = arith.constant 0 : index
    %15 = memref.load %arg7[%c0_9, %c0_10] : memref<1x1xf32, #tpu.memory_space<smem>>
    %16 = vector.broadcast %15 : f32 to vector<16x1xf32>
    %17 = arith.addf %14, %16 : vector<16x1xf32>
    %18 = arith.negf %17 : vector<16x1xf32>
    %19 = math.exp %18 : vector<16x1xf32>
    %cst_11 = arith.constant 1.000000e+00 : f32
    %20 = vector.broadcast %cst_11 : f32 to vector<16x1xf32>
    %21 = arith.addf %20, %19 : vector<16x1xf32>
    %22 = arith.divf %20, %21 : vector<16x1xf32>
    %23 = arith.subf %8, %9 : vector<16x128xf32>
    %24 = vector.broadcast %22 : vector<16x1xf32> to vector<16x128xf32>
    %25 = arith.mulf %24, %23 : vector<16x128xf32>
    %26 = arith.addf %9, %25 : vector<16x128xf32>
    %c0_12 = arith.constant 0 : index
    %c0_13 = arith.constant 0 : index
    %27 = vector.load %arg4[%c0_12, %c0_13] : memref<128x128xf32, #tpu.memory_space<vmem>>, vector<128x128xf32>
    %cst_14 = arith.constant dense<0.000000e+00> : vector<16x128xf32>
    %28 = tpu.matmul %26, %27, %cst_14 {dimension_numbers = #tpu.dot_dimension_numbers<[1], [0], [0], [1], [0, 0, 1, 1], [], []>} : vector<16x128xf32>, vector<128x128xf32>, vector<16x128xf32> -> vector<16x128xf32>
    %c0_15 = arith.constant 0 : index
    %c0_16 = arith.constant 0 : index
    %29 = vector.load %arg5[%c0_15, %c0_16] : memref<1x128xf32, #tpu.memory_space<vmem>>, vector<1x128xf32>
    %30 = vector.broadcast %29 : vector<1x128xf32> to vector<16x128xf32>
    %31 = arith.addf %28, %30 : vector<16x128xf32>
    %c0_17 = arith.constant 0 : index
    %c0_18 = arith.constant 0 : index
    %32 = vector.load %arg8[%c0_17, %c0_18] : memref<16x128xf32, #tpu.memory_space<vmem>>, vector<16x128xf32>
    tpu.vector_store %arg8[%c0_17, %c0_18], %31 {strides = array<i32>} : memref<16x128xf32, #tpu.memory_space<vmem>>, vector<16x128xf32>,
    return
  }
  func.func @transform_0(%arg0: i32) -> (i32, i32) {
    %c0_i32 = arith.constant 0 : i32
    %c0_i32_0 = arith.constant 0 : i32
    return %arg0, %c0_i32 : i32, i32
  }
  func.func @transform_1(%arg0: i32) -> (i32, i32) {
    %c0_i32 = arith.constant 0 : i32
    %c0_i32_0 = arith.constant 0 : i32
    %c0_i32_1 = arith.constant 0 : i32
    return %c0_i32, %c0_i32_0 : i32, i32
  }
  func.func @transform_2(%arg0: i32) -> (i32, i32) {
    %c0_i32 = arith.constant 0 : i32
    %c0_i32_0 = arith.constant 0 : i32
    %c0_i32_1 = arith.constant 0 : i32
    return %c0_i32, %c0_i32_0 : i32, i32
  }
  func.func @transform_3(%arg0: i32) -> (i32, i32) {
    %c0_i32 = arith.constant 0 : i32
    %c0_i32_0 = arith.constant 0 : i32
    %c0_i32_1 = arith.constant 0 : i32
    return %c0_i32, %c0_i32_0 : i32, i32
  }
  func.func @transform_4(%arg0: i32) -> (i32, i32) {
    %c0_i32 = arith.constant 0 : i32
    %c0_i32_0 = arith.constant 0 : i32
    %c0_i32_1 = arith.constant 0 : i32
    return %c0_i32, %c0_i32_0 : i32, i32
  }
  func.func @transform_5(%arg0: i32) -> (i32, i32) {
    %c0_i32 = arith.constant 0 : i32
    %c0_i32_0 = arith.constant 0 : i32
    %c0_i32_1 = arith.constant 0 : i32
    return %c0_i32, %c0_i32_0 : i32, i32
  }
  func.func @transform_6(%arg0: i32) -> (i32, i32) {
    %c0_i32 = arith.constant 0 : i32
    %c0_i32_0 = arith.constant 0 : i32
    %c0_i32_1 = arith.constant 0 : i32
    return %c0_i32, %c0_i32_0 : i32, i32
  }
  func.func @transform_7(%arg0: i32) -> (i32, i32) {
    %c0_i32 = arith.constant 0 : i32
    %c0_i32_0 = arith.constant 0 : i32
    return %arg0, %c0_i32 : i32, i32
  }
}

</mosaic_0001>

<bundles_post_ra>
// kernel: tpu_custom_call.1
= control target key start
LH: loop header
LB: loop body
LE: loop exit
PB: predicated region body
PF: predicated region fallthrough
CT: control target
= control target key end

     0   :  { %13 = vsyncpa [#allocation4], 0  ;;  %s558_s0 = inlined_call_operand.hbm [shape: bf16[16,48], index: 0, kind: input, shape index: {}]   ;;  %s559_s1 = inlined_call_operand.hbm [shape: bf16[48,256], index: 1, kind: input, shape index: {}]   ;;  %s560_s2 = inlined_call_operand.vmem [shape: f32[1,256], index: 2, kind: input, shape index: {}]   ;;  %s561_s3 = inlined_call_operand.hbm [shape: f32[128,128], index: 3, kind: input, shape index: {}]   ;;  %s562_s4 = inlined_call_operand.vmem [shape: f32[1,128], index: 4, kind: input, shape index: {}]   ;;  %s563_s5 = inlined_call_operand.vmem [shape: f32[1,128], index: 5, kind: input, shape index: {}]   ;;  %s564_s6 = inlined_call_operand.<no memory space> [shape: f32[1,1], index: 6, kind: input, shape index: {}]   ;;  %s565_s7 = inlined_call_operand.hbm [shape: f32[16,128], index: 7, kind: output, shape index: {}]  }
   0x1   :  { %14 = vsyncpa [#allocation7], 0  ;;  %s33_s26 = sshll.u32 %s559_s1, 4  ;;  %s34_s26 = int_to_ptr.hbm [resolvable:$true] %s33_s26 }
   0x2   :  { %15 = vsyncpa [#allocation5], 0  ;;  %s459_s27 = smov [#allocation6]   ;;  %s20_s8 = sshll.u32 %s558_s0, 4  ;;  %s21_s8 = int_to_ptr.hbm [resolvable:$true] %s20_s8 }
   0x3   :  { %s35_s28 = sshll.u32 %s459_s27, 4  ;;  %s460_s9 = smov 128   ;;  %s36_s28 = int_to_ptr.vmem [resolvable:$true] %s35_s28 }
   0x4   :  { %s461_s10 = smov 8   ;;  %s462_s11 = smov [#allocation3]  }
   0x5   :  { %41 = dma.hbm_to_vmem [thread:$0]  %s34_s26, 768, %s36_s28, [#allocation7], %s460_s9, %s460_s9, %s461_s10  }
   0x6   :  { %s22_s12 = sshll.u32 %s462_s11, 4  ;;  %s463_s1 = smov 64   ;;  %s23_s12 = int_to_ptr.vmem [resolvable:$true] %s22_s12 }
   0x7   :  { %s464_s13 = smov 4   ;;  %s48_s16 = sshll.u32 %s561_s3, 4  ;;  %s49_s16 = int_to_ptr.hbm [resolvable:$true] %s48_s16 }
   0x8   :  { %28 = dma.hbm_to_vmem [thread:$0]  %s21_s8, 128, %s23_s12, [#allocation4], %s463_s1, %s463_s1, %s464_s13  }
   0x9   :  { %s465_s17 = smov [#allocation8]  }
   0xa   :  { %s50_s0 = sshll.u32 %s465_s17, 4  ;;  %s51_s0 = int_to_ptr.vmem [resolvable:$true] %s50_s0 }
   0xb   :  { %56 = dma.hbm_to_vmem [thread:$0]  %s49_s16, 2048, %s51_s0, [#allocation7], %s460_s9, %s460_s9, %s461_s10  }
   0xc   :  { %453 = dma.done.wait [#allocation4], 128  }
   0xd   :  { %454 = vsyncadd [#allocation4], 4294967168 }
   0xe   :  { %455 = dma.done.wait [#allocation7], 2816  }
   0xf   :  { %456 = vsyncadd [#allocation7], 4294964480  ;;  %v306_v0 = vld [vmem:[#allocation6 + $0x20] sm:$0xf]  ;;  %v322_v1 = vld [vmem:[#allocation6 + $0x24] sm:$0xf0]  ;;  %v172_v44 = vstv %s564_s6 }
  0x10   :  { %v321_v2 = vld [vmem:[#allocation6 + $0x24] sm:$0xf]  ;;  %v307_v3 = vor.u32 %v322_v1, %v306_v0  ;;  %v308_v4 = vld [vmem:[#allocation6 + $0x28] sm:$0xf0]  ;;  %v298_v5 = vld [vmem:[#allocation6 + $0x10] sm:$0xf] }
  0x11   :  { %v320_v6 = vld [vmem:[#allocation6 + $0x14] sm:$0xf0]  ;;  %v311_v7 = vor.u32 %v321_v2, %v308_v4  ;;  %v319_v8 = vld [vmem:[#allocation6 + $0x14] sm:$0xf]  ;;  %v300_v9 = vld [vmem:[#allocation6 + $0x18] sm:$0xf0] }
  0x12   :  { %134 = vmatpush.bf16.msra.mxu0 %v307_v3  ;;  %v299_v10 = vor.u32 %v320_v6, %v298_v5  ;;  %v303_v11 = vor.u32 %v319_v8, %v300_v9  ;;  %v290_v12 = vld [vmem:[#allocation6] sm:$0xf]  ;;  %v318_v13 = vld [vmem:[#allocation6 + $0x4] sm:$0xf0]  ;;  %v317_v14 = vld [vmem:[#allocation6 + $0x4] sm:$0xf] }
  0x13   :  { %148 = vmatpush.bf16.msra.mxu1 %v311_v7  ;;  %v292_v15 = vld [vmem:[#allocation6 + $0x8] sm:$0xf0]  ;;  %v291_v16 = vor.u32 %v318_v13, %v290_v12  ;;  %v316_v18 = vld [vmem:[#allocation3] sm:$0xff]  ;;  %vm125_vm0 = vcmask 392192   ;;  %v233_v31 = vld [vmem:[#allocation8 + $0x70] sm:$0xff]  ;;  %s466_s22 = smov [#allocation9]  }
  0x14   :  { %v295_v17 = vor.u32 %v317_v14, %v292_v15  ;;  %v525_v19 = vld [vmem:[%s560_s2] sm:$0x3]  ;;  %v234_v30 = vld [vmem:[#allocation8 + $0x78] sm:$0xff]  ;;  %v231_v33 = vld [vmem:[#allocation8 + $0x60] sm:$0xff]  ;;  %s268_s23 = sshll.u32 %s466_s22, 4  ;;  %s270_s26 = sshll.u32 %s565_s7, 4  ;;  %s269_s23 = int_to_ptr.vmem [resolvable:$true] %s268_s23  ;;  %s271_s26 = int_to_ptr.hbm [resolvable:$true] %s270_s26 }
  0x15   :  { %v86_v20 = vperm.slane %v525_v19, 0  ;;  %v347_v23 = vld [vmem:[%s563_s5] ss:$0 sm:$0xff]  ;;  %239 = vmatpush.msra.mxu2 %v234_v30  ;;  %323 = vmatpush.msra.mxu3 %v234_v30  ;;  %v230_v34 = vld [vmem:[#allocation8 + $0x58] sm:$0xff]  ;;  %v229_v35 = vld [vmem:[#allocation8 + $0x50] sm:$0xff]  ;;  %v87_v56 = vperm.slane %v525_v19, 1 }
  0x16   :  { %135 = vmatpush.bf16.msra.mxu0 %v299_v10  ;;  %v232_v32 = vld [vmem:[#allocation8 + $0x68] sm:$0xff]  ;;  %v227_v37 = vld [vmem:[#allocation8 + $0x40] sm:$0xff]  ;;  %v226_v38 = vld [vmem:[#allocation8 + $0x38] sm:$0xff] }
  0x17   :  { %149 = vmatpush.bf16.msra.mxu1 %v303_v11  ;;  %240 = vmatpush.msra.mxu2 %v233_v31  ;;  %v228_v36 = vld [vmem:[#allocation8 + $0x48] sm:$0xff]  ;;  %v225_v39 = vld [vmem:[#allocation8 + $0x30] sm:$0xff]  ;;  %v223_v41 = vld [vmem:[#allocation8 + $0x20] sm:$0xff] }
  0x18   :  { %324 = vmatpush.msra.mxu3 %v233_v31  ;;  %v224_v40 = vld [vmem:[#allocation8 + $0x28] sm:$0xff]  ;;  %v222_v42 = vld [vmem:[#allocation8 + $0x18] sm:$0xff]  ;;  %v221_v43 = vld [vmem:[#allocation8 + $0x10] sm:$0xff] }
  0x19   :  { %241 = vmatpush.msra.mxu2 %v232_v32  ;;  %v220_v45 = vld [vmem:[#allocation8 + $0x8] sm:$0xff]  ;;  %v219_v47 = vld [vmem:[#allocation8] sm:$0xff] }
  0x1a   :  { %136 = vmatpush.bf16.msra.mxu0 %v291_v16  ;;  %325 = vmatpush.msra.mxu3 %v232_v32 }
  0x1b   :  { %150 = vmatpush.bf16.msra.mxu1 %v295_v17  ;;  %242 = vmatpush.msra.mxu2 %v231_v33 }
  0x1c   :  { %326 = vmatpush.msra.mxu3 %v231_v33 }
  0x1d   :  { %312 = vmatmul.msk.bf16.vlgmr.msra.gmra.mxu0 %vm125_vm0, %v316_v18  ;;  %243 = vmatpush.msra.mxu2 %v230_v34 }
  0x1e   :  { %313 = vmatmul.msk.bf16.vlgmr.msra.gmra.mxu1 %vm125_vm0, %v316_v18  ;;  %327 = vmatpush.msra.mxu3 %v230_v34 }
  0x1f   :  { %244 = vmatpush.msra.mxu2 %v229_v35 }
  0x20   :  { %328 = vmatpush.msra.mxu3 %v229_v35 }
  0x21   :  { %245 = vmatpush.msra.mxu2 %v228_v36 }
  0x22   :  { %329 = vmatpush.msra.mxu3 %v228_v36 }
  0x23   :  { %246 = vmatpush.msra.mxu2 %v227_v37 }
  0x24   :  { %330 = vmatpush.msra.mxu3 %v227_v37 }
  0x25   :  { %247 = vmatpush.msra.mxu2 %v226_v38 }
  0x26   :  { %331 = vmatpush.msra.mxu3 %v226_v38 }
  0x27   :  { %248 = vmatpush.msra.mxu2 %v225_v39 }
  0x28   :  { %332 = vmatpush.msra.mxu3 %v225_v39 }
  0x29   :  { %249 = vmatpush.msra.mxu2 %v224_v40 }
  0x2a   :  { %333 = vmatpush.msra.mxu3 %v224_v40 }
  0x2b   :  { %250 = vmatpush.msra.mxu2 %v223_v41 }
  0x2c   :  { %334 = vmatpush.msra.mxu3 %v223_v41 }
  0x2d   :  { %251 = vmatpush.msra.mxu2 %v222_v42 }
  0x2e   :  { %335 = vmatpush.msra.mxu3 %v222_v42 }
  0x2f   :  { %252 = vmatpush.msra.mxu2 %v221_v43 }
  0x30   :  { %336 = vmatpush.msra.mxu3 %v221_v43 }
  0x31   :  { %253 = vmatpush.msra.mxu2 %v220_v45 }
  0x32   :  { %337 = vmatpush.msra.mxu3 %v220_v45 }
  0x33   :  { %254 = vmatpush.msra.mxu2 %v219_v47 }
  0x34   :  { %338 = vmatpush.msra.mxu3 %v219_v47 }
  0x9a   :  { %v138_v21 = vpop.f32.mrf.mxu0 }
  0x9b   :  { %v528_v22 = vadd.f32 %v138_v21, %v86_v20  ;;  %v152_v55 = vpop.f32.mrf.mxu1 }
  0x9c   :  { %v153_v60 = vadd.f32 %v152_v55, %v87_v56 }
  0x9d   :  { %v157_v24 = vmax.f32 %v528_v22, 0.0 }
  0x9e   :  { %v158_v0 = vmax.f32 %v153_v60, 0.0 }
  0x9f   :  { %v165_v25 = vmul.f32 %v347_v23, %v157_v24 }
  0xa0   :  { %v213_v8 = vsub.f32 %v157_v24, %v158_v0 }
  0xa1   :  { %167 = vadd.xlane.f32.xlu0 %v165_v25 }
  0xa2   :  { %v140_v26 = vpop.f32.mrf.mxu0 }
  0xa3   :  { %v536_v27 = vadd.f32 %v140_v26, %v86_v20  ;;  %v154_v1 = vpop.f32.mrf.mxu1  ;;  %v348_v26 = vld [vmem:[%s562_s4] ss:$0 sm:$0xff] }
  0xa4   :  { %v155_v6 = vadd.f32 %v154_v1, %v87_v56 }
  0xa5   :  { %v159_v28 = vmax.f32 %v536_v27, 0.0 }
  0xa6   :  { %v160_v14 = vmax.f32 %v155_v6, 0.0 }
  0xa7   :  { %v166_v29 = vmul.f32 %v347_v23, %v159_v28 }
  0xa8   :  { %v214_v21 = vsub.f32 %v159_v28, %v160_v14 }
  0xa9   :  { %169 = vadd.xlane.f32.xlu0 %v166_v29 }
 0x114   :  { %v168_v46 = vpop.xlane.xlu0 %167 }
 0x115   :  { %v173_v48 = vadd.f32 %v172_v44, %v168_v46 }
 0x117   :  { %v314_v49 = vmul.f32 -1.442695, %v173_v48 }
 0x119   :  { %349 = vpow2.f32 %v314_v49 }
 0x11c   :  { %v170_v50 = vpop.xlane.xlu0 %169 }
 0x11d   :  { %v174_v51 = vadd.f32 %v172_v44, %v170_v50 }
 0x11f   :  { %v350_v52 = vpop.eup %349  ;;  %v315_v53 = vmul.f32 -1.442695, %v174_v51 }
 0x120   :  { %v181_v54 = vadd.f32 1.0, %v350_v52 }
 0x121   :  { %351 = vpow2.f32 %v315_v53 }
 0x122   :  { %353 = vrcp.f32 %v181_v54  ;;  %v194_v63 = vand.u32 2147483648, %v181_v54  ;;  %v192_v3 = vand.u32 2147483647, %v181_v54  ;;  %vm188_vm2 = vweird.f32 %v181_v54 }
 0x124   :  { %v195_v7 = vor.u32 1.1754944e-38, %v194_v63  ;;  %vm193_vm4 = vcmp.eq.f32.partialorder %v192_v3, 8.507059e+37 }
 0x127   :  { %v352_v57 = vpop.eup %351 }
 0x128   :  { %v354_v58 = vpop.eup %353  ;;  %v182_v59 = vadd.f32 1.0, %v352_v57 }
 0x129   :  { %v184_v61 = vmul.f32 %v354_v58, %v181_v54  ;;  %vm189_vm1 = vweird.f32 %v354_v58 }
 0x12a   :  { %355 = vrcp.f32 %v182_v59  ;;  %vm190_vm3 = vmor %vm188_vm2, %vm189_vm1  ;;  %v209_v15 = vand.u32 2147483648, %v182_v59  ;;  %v207_v18 = vand.u32 2147483647, %v182_v59  ;;  %vm203_vm6 = vweird.f32 %v182_v59 }
 0x12b   :  { %v185_v62 = vsub.f32 1.0, %v184_v61 }
 0x12c   :  { %v210_v20 = vor.u32 1.1754944e-38, %v209_v15  ;;  %vm208_vm8 = vcmp.eq.f32.partialorder %v207_v18, 8.507059e+37 }
 0x12d   :  { %v186_v2 = vmul.f32 %v354_v58, %v185_v62 }
 0x12f   :  { %v187_v4 = vadd.f32 %v354_v58, %v186_v2 }
 0x130   :  { %v356_v5 = vpop.eup %355 }
 0x131   :  { %v191_v9 = vsel %vm190_vm3, %v354_v58, %v187_v4  ;;  %v199_v10 = vmul.f32 %v356_v5, %v182_v59  ;;  %vm204_vm5 = vweird.f32 %v356_v5 }
 0x132   :  { %v196_v11 = vsel %vm193_vm4, %v195_v7, %v191_v9  ;;  %vm205_vm7 = vmor %vm203_vm6, %vm204_vm5 }
 0x133   :  { %v215_v12 = vmul.f32 %v213_v8, %v196_v11  ;;  %v200_v13 = vsub.f32 1.0, %v199_v10 }
 0x135   :  { %v217_v16 = vadd.f32 %v215_v12, %v158_v0  ;;  %v201_v17 = vmul.f32 %v356_v5, %v200_v13 }
 0x137   :  { %255 = vmatmul.f32.vlgmr.msra.gmra.mxu2 %v217_v16  ;;  %v202_v19 = vadd.f32 %v356_v5, %v201_v17 }
 0x139   :  { %v206_v22 = vsel %vm205_vm7, %v356_v5, %v202_v19 }
 0x13a   :  { %v211_v23 = vsel %vm208_vm8, %v210_v20, %v206_v22 }
 0x13b   :  { %v216_v24 = vmul.f32 %v214_v21, %v211_v23 }
 0x13d   :  { %v218_v25 = vadd.f32 %v216_v24, %v160_v14 }
 0x13f   :  { %258 = vmatmul.f32.vlgmr.msra.gmra.mxu3 %v218_v25 }
 0x1ba   :  { %v256_v29 = vpop.f32.mrf.mxu2 }
 0x1bb   :  { %v257_v30 = vadd.f32 %v348_v26, %v256_v29 }
 0x1bd   :  { %262 = vst [vmem:[#allocation9] sm:$0xff] %v257_v30 }
 0x1c2   :  { %v259_v27 = vpop.f32.mrf.mxu3 }
 0x1c3   :  { %v260_v28 = vadd.f32 %v348_v26, %v259_v27 }
 0x1c5   :  { %263 = vst [vmem:[#allocation9 + $0x8] sm:$0xff] %v260_v28 }
 0x1c6   :  { %276 = dma.vmem_to_hbm [thread:$0]  %s269_s23, 256, %s271_s26, [#allocation5], %s460_s9, %s460_s9, %s461_s10  }
 0x1c7   :  { %457 = dma.done.wait [#allocation5], 256  }
 0x1c8   :  { %458 = vsyncadd [#allocation5], 4294967040 }
 0x1c9   :  { %281 = vsyncpa [#allocation4], 1 }
 0x1ca   :  { %282 = vsyncpa [#allocation7], 1 }
 0x1cb   :  { %283 = vsyncpa [#allocation5], 1 }

// kernel: tpu_custom_call.1
= control target key start
LH: loop header
LB: loop body
LE: loop exit
PB: predicated region body
PF: predicated region fallthrough
CT: control target
= control target key end

     0   :  { %13 = vsyncpa [#allocation4], 0  ;;  %s558_s0 = inlined_call_operand.hbm [shape: bf16[16,48], index: 0, kind: input, shape index: {}]   ;;  %s559_s1 = inlined_call_operand.hbm [shape: bf16[48,256], index: 1, kind: input, shape index: {}]   ;;  %s560_s2 = inlined_call_operand.vmem [shape: f32[1,256], index: 2, kind: input, shape index: {}]   ;;  %s561_s3 = inlined_call_operand.hbm [shape: f32[128,128], index: 3, kind: input, shape index: {}]   ;;  %s562_s4 = inlined_call_operand.vmem [shape: f32[1,128], index: 4, kind: input, shape index: {}]   ;;  %s563_s5 = inlined_call_operand.vmem [shape: f32[1,128], index: 5, kind: input, shape index: {}]   ;;  %s564_s6 = inlined_call_operand.<no memory space> [shape: f32[1,1], index: 6, kind: input, shape index: {}]   ;;  %s565_s7 = inlined_call_operand.hbm [shape: f32[16,128], index: 7, kind: output, shape index: {}]  }
   0x1   :  { %14 = vsyncpa [#allocation7], 0  ;;  %s33_s26 = sshll.u32 %s559_s1, 4  ;;  %s34_s26 = int_to_ptr.hbm [resolvable:$true] %s33_s26 }
   0x2   :  { %15 = vsyncpa [#allocation5], 0  ;;  %s459_s27 = smov [#allocation6]   ;;  %s20_s8 = sshll.u32 %s558_s0, 4  ;;  %s21_s8 = int_to_ptr.hbm [resolvable:$true] %s20_s8 }
   0x3   :  { %s35_s28 = sshll.u32 %s459_s27, 4  ;;  %s460_s9 = smov 128   ;;  %s36_s28 = int_to_ptr.vmem [resolvable:$true] %s35_s28 }
   0x4   :  { %s461_s10 = smov 8   ;;  %s462_s11 = smov [#allocation3]  }
   0x5   :  { %41 = dma.hbm_to_vmem [thread:$0]  %s34_s26, 768, %s36_s28, [#allocation7], %s460_s9, %s460_s9, %s461_s10  }
   0x6   :  { %s22_s12 = sshll.u32 %s462_s11, 4  ;;  %s463_s1 = smov 64   ;;  %s23_s12 = int_to_ptr.vmem [resolvable:$true] %s22_s12 }
   0x7   :  { %s464_s13 = smov 4   ;;  %s48_s16 = sshll.u32 %s561_s3, 4  ;;  %s49_s16 = int_to_ptr.hbm [resolvable:$true] %s48_s16 }
   0x8   :  { %28 = dma.hbm_to_vmem [thread:$0]  %s21_s8, 128, %s23_s12, [#allocation4], %s463_s1, %s463_s1, %s464_s13  }
   0x9   :  { %s465_s17 = smov [#allocation8]  }
   0xa   :  { %s50_s0 = sshll.u32 %s465_s17, 4  ;;  %s51_s0 = int_to_ptr.vmem [resolvable:$true] %s50_s0 }
   0xb   :  { %56 = dma.hbm_to_vmem [thread:$0]  %s49_s16, 2048, %s51_s0, [#allocation7], %s460_s9, %s460_s9, %s461_s10  }
   0xc   :  { %453 = dma.done.wait [#allocation4], 128  }
   0xd   :  { %454 = vsyncadd [#allocation4], 4294967168 }
   0xe   :  { %455 = dma.done.wait [#allocation7], 2816  }
   0xf   :  { %456 = vsyncadd [#allocation7], 4294964480  ;;  %v306_v0 = vld [vmem:[#allocation6 + $0x20] sm:$0xf]  ;;  %v322_v1 = vld [vmem:[#allocation6 + $0x24] sm:$0xf0]  ;;  %v172_v44 = vstv %s564_s6 }
  0x10   :  { %v321_v2 = vld [vmem:[#allocation6 + $0x24] sm:$0xf]  ;;  %v307_v3 = vor.u32 %v322_v1, %v306_v0  ;;  %v308_v4 = vld [vmem:[#allocation6 + $0x28] sm:$0xf0]  ;;  %v298_v5 = vld [vmem:[#allocation6 + $0x10] sm:$0xf] }
  0x11   :  { %v320_v6 = vld [vmem:[#allocation6 + $0x14] sm:$0xf0]  ;;  %v311_v7 = vor.u32 %v321_v2, %v308_v4  ;;  %v319_v8 = vld [vmem:[#allocation6 + $0x14] sm:$0xf]  ;;  %v300_v9 = vld [vmem:[#allocation6 + $0x18] sm:$0xf0] }
  0x12   :  { %134 = vmatpush.bf16.msra.mxu0 %v307_v3  ;;  %v299_v10 = vor.u32 %v320_v6, %v298_v5  ;;  %v303_v11 = vor.u32 %v319_v8, %v300_v9  ;;  %v290_v12 = vld [vmem:[#allocation6] sm:$0xf]  ;;  %v318_v13 = vld [vmem:[#allocation6 + $0x4] sm:$0xf0]  ;;  %v317_v14 = vld [vmem:[#allocation6 + $0x4] sm:$0xf] }
  0x13   :  { %148 = vmatpush.bf16.msra.mxu1 %v311_v7  ;;  %v292_v15 = vld [vmem:[#allocation6 + $0x8] sm:$0xf0]  ;;  %v291_v16 = vor.u32 %v318_v13, %v290_v12  ;;  %v316_v18 = vld [vmem:[#allocation3] sm:$0xff]  ;;  %vm125_vm0 = vcmask 392192   ;;  %v233_v31 = vld [vmem:[#allocation8 + $0x70] sm:$0xff]  ;;  %s466_s22 = smov [#allocation9]  }
  0x14   :  { %v295_v17 = vor.u32 %v317_v14, %v292_v15  ;;  %v525_v19 = vld [vmem:[%s560_s2] sm:$0x3]  ;;  %v234_v30 = vld [vmem:[#allocation8 + $0x78] sm:$0xff]  ;;  %v231_v33 = vld [vmem:[#allocation8 + $0x60] sm:$0xff]  ;;  %s268_s23 = sshll.u32 %s466_s22, 4  ;;  %s270_s26 = sshll.u32 %s565_s7, 4  ;;  %s269_s23 = int_to_ptr.vmem [resolvable:$true] %s268_s23  ;;  %s271_s26 = int_to_ptr.hbm [resolvable:$true] %s270_s26 }
  0x15   :  { %v86_v20 = vperm.slane %v525_v19, 0  ;;  %v347_v23 = vld [vmem:[%s563_s5] ss:$0 sm:$0xff]  ;;  %239 = vmatpush.msra.mxu2 %v234_v30  ;;  %323 = vmatpush.msra.mxu3 %v234_v30  ;;  %v230_v34 = vld [vmem:[#allocation8 + $0x58] sm:$0xff]  ;;  %v229_v35 = vld [vmem:[#allocation8 + $0x50] sm:$0xff]  ;;  %v87_v56 = vperm.slane %v525_v19, 1 }
  0x16   :  { %135 = vmatpush.bf16.msra.mxu0 %v299_v10  ;;  %v232_v32 = vld [vmem:[#allocation8 + $0x68] sm:$0xff]  ;;  %v227_v37 = vld [vmem:[#allocation8 + $0x40] sm:$0xff]  ;;  %v226_v38 = vld [vmem:[#allocation8 + $0x38] sm:$0xff] }
  0x17   :  { %149 = vmatpush.bf16.msra.mxu1 %v303_v11  ;;  %240 = vmatpush.msra.mxu2 %v233_v31  ;;  %v228_v36 = vld [vmem:[#allocation8 + $0x48] sm:$0xff]  ;;  %v225_v39 = vld [vmem:[#allocation8 + $0x30] sm:$0xff]  ;;  %v223_v41 = vld [vmem:[#allocation8 + $0x20] sm:$0xff] }
  0x18   :  { %324 = vmatpush.msra.mxu3 %v233_v31  ;;  %v224_v40 = vld [vmem:[#allocation8 + $0x28] sm:$0xff]  ;;  %v222_v42 = vld [vmem:[#allocation8 + $0x18] sm:$0xff]  ;;  %v221_v43 = vld [vmem:[#allocation8 + $0x10] sm:$0xff] }
  0x19   :  { %241 = vmatpush.msra.mxu2 %v232_v32  ;;  %v220_v45 = vld [vmem:[#allocation8 + $0x8] sm:$0xff]  ;;  %v219_v47 = vld [vmem:[#allocation8] sm:$0xff] }
  0x1a   :  { %136 = vmatpush.bf16.msra.mxu0 %v291_v16  ;;  %325 = vmatpush.msra.mxu3 %v232_v32 }
  0x1b   :  { %150 = vmatpush.bf16.msra.mxu1 %v295_v17  ;;  %242 = vmatpush.msra.mxu2 %v231_v33 }
  0x1c   :  { %326 = vmatpush.msra.mxu3 %v231_v33 }
  0x1d   :  { %312 = vmatmul.msk.bf16.vlgmr.msra.gmra.mxu0 %vm125_vm0, %v316_v18  ;;  %243 = vmatpush.msra.mxu2 %v230_v34 }
  0x1e   :  { %313 = vmatmul.msk.bf16.vlgmr.msra.gmra.mxu1 %vm125_vm0, %v316_v18  ;;  %327 = vmatpush.msra.mxu3 %v230_v34 }
  0x1f   :  { %244 = vmatpush.msra.mxu2 %v229_v35 }
  0x20   :  { %328 = vmatpush.msra.mxu3 %v229_v35 }
  0x21   :  { %245 = vmatpush.msra.mxu2 %v228_v36 }
  0x22   :  { %329 = vmatpush.msra.mxu3 %v228_v36 }
  0x23   :  { %246 = vmatpush.msra.mxu2 %v227_v37 }
  0x24   :  { %330 = vmatpush.msra.mxu3 %v227_v37 }
  0x25   :  { %247 = vmatpush.msra.mxu2 %v226_v38 }
  0x26   :  { %331 = vmatpush.msra.mxu3 %v226_v38 }
  0x27   :  { %248 = vmatpush.msra.mxu2 %v225_v39 }
  0x28   :  { %332 = vmatpush.msra.mxu3 %v225_v39 }
  0x29   :  { %249 = vmatpush.msra.mxu2 %v224_v40 }
  0x2a   :  { %333 = vmatpush.msra.mxu3 %v224_v40 }
  0x2b   :  { %250 = vmatpush.msra.mxu2 %v223_v41 }
  0x2c   :  { %334 = vmatpush.msra.mxu3 %v223_v41 }
  0x2d   :  { %251 = vmatpush.msra.mxu2 %v222_v42 }
  0x2e   :  { %335 = vmatpush.msra.mxu3 %v222_v42 }
  0x2f   :  { %252 = vmatpush.msra.mxu2 %v221_v43 }
  0x30   :  { %336 = vmatpush.msra.mxu3 %v221_v43 }
  0x31   :  { %253 = vmatpush.msra.mxu2 %v220_v45 }
  0x32   :  { %337 = vmatpush.msra.mxu3 %v220_v45 }
  0x33   :  { %254 = vmatpush.msra.mxu2 %v219_v47 }
  0x34   :  { %338 = vmatpush.msra.mxu3 %v219_v47 }
  0x9a   :  { %v138_v21 = vpop.f32.mrf.mxu0 }
  0x9b   :  { %v528_v22 = vadd.f32 %v138_v21, %v86_v20  ;;  %v152_v55 = vpop.f32.mrf.mxu1 }
  0x9c   :  { %v153_v60 = vadd.f32 %v152_v55, %v87_v56 }
  0x9d   :  { %v157_v24 = vmax.f32 %v528_v22, 0.0 }
  0x9e   :  { %v158_v0 = vmax.f32 %v153_v60, 0.0 }
  0x9f   :  { %v165_v25 = vmul.f32 %v347_v23, %v157_v24 }
  0xa0   :  { %v213_v8 = vsub.f32 %v157_v24, %v158_v0 }
  0xa1   :  { %167 = vadd.xlane.f32.xlu0 %v165_v25 }
  0xa2   :  { %v140_v26 = vpop.f32.mrf.mxu0 }
  0xa3   :  { %v536_v27 = vadd.f32 %v140_v26, %v86_v20  ;;  %v154_v1 = vpop.f32.mrf.mxu1  ;;  %v348_v26 = vld [vmem:[%s562_s4] ss:$0 sm:$0xff] }
  0xa4   :  { %v155_v6 = vadd.f32 %v154_v1, %v87_v56 }
  0xa5   :  { %v159_v28 = vmax.f32 %v536_v27, 0.0 }
  0xa6   :  { %v160_v14 = vmax.f32 %v155_v6, 0.0 }
  0xa7   :  { %v166_v29 = vmul.f32 %v347_v23, %v159_v28 }
  0xa8   :  { %v214_v21 = vsub.f32 %v159_v28, %v160_v14 }
  0xa9   :  { %169 = vadd.xlane.f32.xlu0 %v166_v29 }
 0x114   :  { %v168_v46 = vpop.xlane.xlu0 %167 }
 0x115   :  { %v173_v48 = vadd.f32 %v172_v44, %v168_v46 }
 0x117   :  { %v314_v49 = vmul.f32 -1.442695, %v173_v48 }
 0x119   :  { %349 = vpow2.f32 %v314_v49 }
 0x11c   :  { %v170_v50 = vpop.xlane.xlu0 %169 }
 0x11d   :  { %v174_v51 = vadd.f32 %v172_v44, %v170_v50 }
 0x11f   :  { %v350_v52 = vpop.eup %349  ;;  %v315_v53 = vmul.f32 -1.442695, %v174_v51 }
 0x120   :  { %v181_v54 = vadd.f32 1.0, %v350_v52 }
 0x121   :  { %351 = vpow2.f32 %v315_v53 }
 0x122   :  { %353 = vrcp.f32 %v181_v54  ;;  %v194_v63 = vand.u32 2147483648, %v181_v54  ;;  %v192_v3 = vand.u32 2147483647, %v181_v54  ;;  %vm188_vm2 = vweird.f32 %v181_v54 }
 0x124   :  { %v195_v7 = vor.u32 1.1754944e-38, %v194_v63  ;;  %vm193_vm4 = vcmp.eq.f32.partialorder %v192_v3, 8.507059e+37 }
 0x127   :  { %v352_v57 = vpop.eup %351 }
 0x128   :  { %v354_v58 = vpop.eup %353  ;;  %v182_v59 = vadd.f32 1.0, %v352_v57 }
 0x129   :  { %v184_v61 = vmul.f32 %v354_v58, %v181_v54  ;;  %vm189_vm1 = vweird.f32 %v354_v58 }
 0x12a   :  { %355 = vrcp.f32 %v182_v59  ;;  %vm190_vm3 = vmor %vm188_vm2, %vm189_vm1  ;;  %v209_v15 = vand.u32 2147483648, %v182_v59  ;;  %v207_v18 = vand.u32 2147483647, %v182_v59  ;;  %vm203_vm6 = vweird.f32 %v182_v59 }
 0x12b   :  { %v185_v62 = vsub.f32 1.0, %v184_v61 }
 0x12c   :  { %v210_v20 = vor.u32 1.1754944e-38, %v209_v15  ;;  %vm208_vm8 = vcmp.eq.f32.partialorder %v207_v18, 8.507059e+37 }
 0x12d   :  { %v186_v2 = vmul.f32 %v354_v58, %v185_v62 }
 0x12f   :  { %v187_v4 = vadd.f32 %v354_v58, %v186_v2 }
 0x130   :  { %v356_v5 = vpop.eup %355 }
 0x131   :  { %v191_v9 = vsel %vm190_vm3, %v354_v58, %v187_v4  ;;  %v199_v10 = vmul.f32 %v356_v5, %v182_v59  ;;  %vm204_vm5 = vweird.f32 %v356_v5 }
 0x132   :  { %v196_v11 = vsel %vm193_vm4, %v195_v7, %v191_v9  ;;  %vm205_vm7 = vmor %vm203_vm6, %vm204_vm5 }
 0x133   :  { %v215_v12 = vmul.f32 %v213_v8, %v196_v11  ;;  %v200_v13 = vsub.f32 1.0, %v199_v10 }
 0x135   :  { %v217_v16 = vadd.f32 %v215_v12, %v158_v0  ;;  %v201_v17 = vmul.f32 %v356_v5, %v200_v13 }
 0x137   :  { %255 = vmatmul.f32.vlgmr.msra.gmra.mxu2 %v217_v16  ;;  %v202_v19 = vadd.f32 %v356_v5, %v201_v17 }
 0x139   :  { %v206_v22 = vsel %vm205_vm7, %v356_v5, %v202_v19 }
 0x13a   :  { %v211_v23 = vsel %vm208_vm8, %v210_v20, %v206_v22 }
 0x13b   :  { %v216_v24 = vmul.f32 %v214_v21, %v211_v23 }
 0x13d   :  { %v218_v25 = vadd.f32 %v216_v24, %v160_v14 }
 0x13f   :  { %258 = vmatmul.f32.vlgmr.msra.gmra.mxu3 %v218_v25 }
 0x1ba   :  { %v256_v29 = vpop.f32.mrf.mxu2 }
 0x1bb   :  { %v257_v30 = vadd.f32 %v348_v26, %v256_v29 }
 0x1bd   :  { %262 = vst [vmem:[#allocation9] sm:$0xff] %v257_v30 }
 0x1c2   :  { %v259_v27 = vpop.f32.mrf.mxu3 }
 0x1c3   :  { %v260_v28 = vadd.f32 %v348_v26, %v259_v27 }
 0x1c5   :  { %263 = vst [vmem:[#allocation9 + $0x8] sm:$0xff] %v260_v28 }
 0x1c6   :  { %276 = dma.vmem_to_hbm [thread:$0]  %s269_s23, 256, %s271_s26, [#allocation5], %s460_s9, %s460_s9, %s461_s10  }
 0x1c7   :  { %457 = dma.done.wait [#allocation5], 256  }
 0x1c8   :  { %458 = vsyncadd [#allocation5], 4294967040 }
 0x1c9   :  { %281 = vsyncpa [#allocation4], 1 }
 0x1ca   :  { %282 = vsyncpa [#allocation7], 1 }
 0x1cb   :  { %283 = vsyncpa [#allocation5], 1 }

</bundles_post_ra>
